<compile_context>
chip_gen: v7x
topology: tpu7x:2x2x1
jax: 0.10.0
libtpu: 0.0.40
codegen_flags: <defaults>
</compile_context>

<pallas_src>
import jax
import jax.numpy as jnp
import numpy as np
from jax.experimental import pallas as pl
from jax.experimental.pallas import tpu as pltpu

RELU_SLOPE = 0.2
MATMUL_DTYPE = jnp.float32   # set to jnp.bfloat16 on v6e/v7x for MXU-bound sizes


# ----------------------------------------------------------------------------
# Fused kernel: conv1 -> lrelu -> conv2 -> lrelu -> (+1x1 identity) -> down
# ----------------------------------------------------------------------------
def _fused_block_kernel(x_ref, m1_ref, mid_ref, m2_ref, md_ref,
                        b1_ref, b2_ref, bid_ref,
                        sdn_ref, sup_ref, rd_ref,
                        y_ref, yd_ref):
    cdt = m1_ref.dtype

    def mm(a, b):
        return jnp.dot(a, b, preferred_element_type=jnp.float32)

    x2 = x_ref[0]                                   # (H, W*Cin), lane-dense
    sdn = sdn_ref[...]                              # (H, H): out row h <- h-1
    sup = sup_ref[...]                              # (H, H): out row h <- h+1

    # ---- conv_1 (3x3, pad 1) + bias, LeakyReLU ------------------------------
    xd = mm(sdn, x2).astype(cdt)                    # x row h-1 (zero top row)
    xu = mm(sup, x2).astype(cdt)                    # x row h+1 (zero bottom row)
    a1 = (mm(xd, m1_ref[0]) + mm(x2, m1_ref[1]) + mm(xu, m1_ref[2])
          + b1_ref[...])                            # (H, W*Cout) f32
    y1 = jnp.where(a1 >= 0, a1, RELU_SLOPE * a1)    # relu_1

    # ---- identity (1x1 conv on x) -------------------------------------------
    ident = mm(x2, mid_ref[...]) + bid_ref[...]     # (H, W*Cout) f32

    # ---- conv_2 (3x3, pad 1) + bias, LeakyReLU, residual add ----------------
    y1c = y1.astype(cdt)
    y1d = mm(sdn, y1c).astype(cdt)
    y1u = mm(sup, y1c).astype(cdt)
    a2 = (mm(y1d, m2_ref[0]) + mm(y1c, m2_ref[1]) + mm(y1u, m2_ref[2])
          + b2_ref[...])
    y = jnp.where(a2 >= 0, a2, RELU_SLOPE * a2) + ident   # (H, W*Cout) f32
    y_ref[0] = y                                    # lane-dense store (128 lanes)

    # ---- downsample (4x4, stride 2, pad 1, no bias) -------------------------
    # rd_ref[dy] is a (Ho, H) 0/1 matrix gathering y rows 2*ho + dy - 1
    # (out-of-range rows -> zero, i.e. the H zero-padding).
    yc = y.astype(cdt)
    yd = mm(mm(rd_ref[0], yc).astype(cdt), md_ref[0])
    for dy in range(1, 4):
        yd = yd + mm(mm(rd_ref[dy], yc).astype(cdt), md_ref[dy])
    yd_ref[0] = yd                                  # (Ho, Wo*Cout) f32


# ----------------------------------------------------------------------------
# Wrapper-side weight folding (one-time prep, plain XLA glue)
# ----------------------------------------------------------------------------
def _prepare_operands(params, H, W):
    Cout = params["w1"].shape[0]
    Ho, Wo = H // 2, W // 2
    cdt = MATMUL_DTYPE

    # PyTorch OIHW -> (dy, dx, ci, co)
    w1 = jnp.transpose(params["w1"], (2, 3, 1, 0))     # (3,3,Cin,Cout)
    w2 = jnp.transpose(params["w2"], (2, 3, 1, 0))     # (3,3,Cout,Cout)
    wd = jnp.transpose(params["wd"], (2, 3, 1, 0))     # (4,4,Cout,Cout)
    wid = params["wid"][:, :, 0, 0].T                  # (Cin,Cout)

    def conv_band(w_dy):
        # w_dy: (3, Ci, Co).  Build M with
        #   M[(w+dx-1)*Ci + ci, w*Co + co] = w_dy[dx, ci, co]
        # (taps falling outside [0, W) are simply absent == zero padding in W).
        m = 0.0
        for dx in range(3):
            shift = np.eye(W, k=-(dx - 1), dtype=np.float32)   # [w+dx-1, w] = 1
            m = m + jnp.kron(shift, w_dy[dx])
        return m                                        # (W*Ci, W*Co)

    def down_band(wd_dy):
        # wd_dy: (4, Co, Co).  M[(2*wo+dx-1)*Co + ci, wo*Co + co] = wd_dy[dx,ci,co]
        m = 0.0
        for dx in range(4):
            sel = np.zeros((W, Wo), np.float32)
            for wo in range(Wo):
                wi = 2 * wo + dx - 1
                if 0 <= wi < W:
                    sel[wi, wo] = 1.0
            m = m + jnp.kron(sel, wd_dy[dx])
        return m                                        # (W*Co, Wo*Co)

    m1 = jnp.stack([conv_band(w1[dy]) for dy in range(3)]).astype(cdt)
    m2 = jnp.stack([conv_band(w2[dy]) for dy in range(3)]).astype(cdt)
    md = jnp.stack([down_band(wd[dy]) for dy in range(4)]).astype(cdt)
    mid = jnp.kron(np.eye(W, dtype=np.float32), wid).astype(cdt)

    # Biases broadcast to the lane-dense layout (1, W*Cout); kept f32.
    b1 = jnp.tile(params["b1"], W)[None, :].astype(jnp.float32)
    b2 = jnp.tile(params["b2"], W)[None, :].astype(jnp.float32)
    bid = jnp.tile(params["bid"], W)[None, :].astype(jnp.float32)

    # Row-shift / stride-2 row-gather matrices (0/1 -> exact in bf16 too).
    sdn = jnp.asarray(np.eye(H, k=-1, dtype=np.float32), cdt)   # row h <- h-1
    sup = jnp.asarray(np.eye(H, k=1, dtype=np.float32), cdt)    # row h <- h+1
    rd_np = np.zeros((4, Ho, H), np.float32)
    for dy in range(4):
        for ho in range(Ho):
            r = 2 * ho + dy - 1
            if 0 <= r < H:
                rd_np[dy, ho, r] = 1.0
    rd = jnp.asarray(rd_np, cdt)

    return m1, mid, m2, md, b1, b2, bid, sdn, sup, rd


# ----------------------------------------------------------------------------
# Full UNetConvBlock forward (downsample=True config)
# ----------------------------------------------------------------------------
def unet_conv_block_forward(x_nchw, params):
    """x_nchw: (N, Cin, H, W) float32. Returns (y_down, y) in NCHW."""
    N, Cin, H, W = x_nchw.shape
    Cout = params["b1"].shape[0]
    Ho, Wo = H // 2, W // 2

    m1, mid, m2, md, b1, b2, bid, sdn, sup, rd = _prepare_operands(params, H, W)

    # NCHW -> lane-dense (N, H, W*Cin)
    x2d = jnp.transpose(x_nchw, (0, 2, 3, 1)).reshape(N, H, W * Cin)
    x2d = x2d.astype(MATMUL_DTYPE)

    y2d, yd2d = pl.pallas_call(
        _fused_block_kernel,
        out_shape=(jax.ShapeDtypeStruct((N, H, W * Cout), jnp.float32),
                   jax.ShapeDtypeStruct((N, Ho, Wo * Cout), jnp.float32)),
        grid_spec=pltpu.PrefetchScalarGridSpec(
            num_scalar_prefetch=0,
            grid=(N,),
            in_specs=[
                pl.BlockSpec((1, H, W * Cin), lambda n: (n, 0, 0)),        # x
                pl.BlockSpec((3, W * Cin, W * Cout), lambda n: (0, 0, 0)),  # M1
                pl.BlockSpec((W * Cin, W * Cout), lambda n: (0, 0)),        # Mid
                pl.BlockSpec((3, W * Cout, W * Cout), lambda n: (0, 0, 0)), # M2
                pl.BlockSpec((4, W * Cout, Wo * Cout), lambda n: (0, 0, 0)),# Md
                pl.BlockSpec((1, W * Cout), lambda n: (0, 0)),              # b1
                pl.BlockSpec((1, W * Cout), lambda n: (0, 0)),              # b2
                pl.BlockSpec((1, W * Cout), lambda n: (0, 0)),              # bid
                pl.BlockSpec((H, H), lambda n: (0, 0)),                     # Sdn
                pl.BlockSpec((H, H), lambda n: (0, 0)),                     # Sup
                pl.BlockSpec((4, Ho, H), lambda n: (0, 0, 0)),              # Rd
            ],
            out_specs=(
                pl.BlockSpec((1, H, W * Cout), lambda n: (n, 0, 0)),        # y
                pl.BlockSpec((1, Ho, Wo * Cout), lambda n: (n, 0, 0)),      # y_down
            ),
        ),
        compiler_params=pltpu.CompilerParams(
            dimension_semantics=("parallel",)),
    )(x2d, m1, mid, m2, md, b1, b2, bid, sdn, sup, rd)

    y = jnp.transpose(y2d.reshape(N, H, W, Cout), (0, 3, 1, 2))
    y_down = jnp.transpose(yd2d.reshape(N, Ho, Wo, Cout), (0, 3, 1, 2))
    return y_down, y


# ----------------------------------------------------------------------------
# Pure-JAX reference (lax.conv) for correctness check
# ----------------------------------------------------------------------------
def _conv_ref(x, w, b, stride, pad):
    out = jax.lax.conv_general_dilated(
        x, w, (stride, stride), [(pad, pad), (pad, pad)],
        dimension_numbers=("NCHW", "OIHW", "NCHW"),
        precision=jax.lax.Precision.HIGHEST)
    if b is not None:
        out = out + b[None, :, None, None]
    return out


def reference_forward(x, p):
    lr = lambda t: jnp.where(t >= 0, t, RELU_SLOPE * t)
    y = lr(_conv_ref(x, p["w1"], p["b1"], 1, 1))
    y = lr(_conv_ref(y, p["w2"], p["b2"], 1, 1))
    y = y + _conv_ref(x, p["wid"], p["bid"], 1, 0)
    y_down = _conv_ref(y, p["wd"], None, 2, 1)
    return y_down, y


if __name__ == "__main__":
    N, Cin, Cout, H, W = 2, 4, 8, 16, 16
    key = jax.random.PRNGKey(0)
    ks = jax.random.split(key, 8)

    x = jax.random.normal(ks[0], (N, Cin, H, W), jnp.float32)
    params = {
        "w1":  0.1 * jax.random.normal(ks[1], (Cout, Cin, 3, 3), jnp.float32),
        "b1":  0.05 * jax.random.normal(ks[2], (Cout,), jnp.float32),
        "w2":  0.1 * jax.random.normal(ks[3], (Cout, Cout, 3, 3), jnp.float32),
        "b2":  0.05 * jax.random.normal(ks[4], (Cout,), jnp.float32),
        "wid": 0.1 * jax.random.normal(ks[5], (Cout, Cin, 1, 1), jnp.float32),
        "bid": 0.05 * jax.random.normal(ks[6], (Cout,), jnp.float32),
        "wd":  0.1 * jax.random.normal(ks[7], (Cout, Cout, 4, 4), jnp.float32),
    }

    y_down, y = jax.jit(unet_conv_block_forward)(x, params)
    jax.block_until_ready((y_down, y))

    yd_ref, y_ref = reference_forward(x, params)
    np.testing.assert_allclose(np.asarray(y), np.asarray(y_ref),
                               rtol=2e-3, atol=2e-3)
    np.testing.assert_allclose(np.asarray(y_down), np.asarray(yd_ref),
                               rtol=2e-3, atol=2e-3)
    print("KERNEL_OK")
</pallas_src>

<mosaic_0001>
module attributes {stable_mosaic.version = 11 : i64} {
  func.func @_fused_block_kernel(%arg0: i32, %arg1: memref<1x16x64xf32, #tpu.memory_space<vmem>>, %arg2: memref<3x64x128xf32, #tpu.memory_space<vmem>>, %arg3: memref<64x128xf32, #tpu.memory_space<vmem>>, %arg4: memref<3x128x128xf32, #tpu.memory_space<vmem>>, %arg5: memref<4x128x64xf32, #tpu.memory_space<vmem>>, %arg6: memref<1x128xf32, #tpu.memory_space<vmem>>, %arg7: memref<1x128xf32, #tpu.memory_space<vmem>>, %arg8: memref<1x128xf32, #tpu.memory_space<vmem>>, %arg9: memref<16x16xf32, #tpu.memory_space<vmem>>, %arg10: memref<16x16xf32, #tpu.memory_space<vmem>>, %arg11: memref<4x8x16xf32, #tpu.memory_space<vmem>>, %arg12: memref<1x16x128xf32, #tpu.memory_space<vmem>>, %arg13: memref<1x8x64xf32, #tpu.memory_space<vmem>>) attributes {dimension_semantics = [#tpu.dimension_semantics<parallel>], iteration_bounds = array<i64: 2>, scalar_prefetch = 0 : i64, scratch_operands = 0 : i64, tpu.core_type = #tpu.core_type<tc>, window_params = [{transform_indices = @transform_0, window_bounds = array<i64: 1, 16, 64>}, {pipeline_mode = #tpu.pipeline_mode<synchronous>, transform_indices = @transform_1, window_bounds = array<i64: 3, 64, 128>}, {pipeline_mode = #tpu.pipeline_mode<synchronous>, transform_indices = @transform_2, window_bounds = array<i64: 64, 128>}, {pipeline_mode = #tpu.pipeline_mode<synchronous>, transform_indices = @transform_3, window_bounds = array<i64: 3, 128, 128>}, {pipeline_mode = #tpu.pipeline_mode<synchronous>, transform_indices = @transform_4, window_bounds = array<i64: 4, 128, 64>}, {pipeline_mode = #tpu.pipeline_mode<synchronous>, transform_indices = @transform_5, window_bounds = array<i64: 1, 128>}, {pipeline_mode = #tpu.pipeline_mode<synchronous>, transform_indices = @transform_6, window_bounds = array<i64: 1, 128>}, {pipeline_mode = #tpu.pipeline_mode<synchronous>, transform_indices = @transform_7, window_bounds = array<i64: 1, 128>}, {pipeline_mode = #tpu.pipeline_mode<synchronous>, transform_indices = @transform_8, window_bounds = array<i64: 16, 16>}, {pipeline_mode = #tpu.pipeline_mode<synchronous>, transform_indices = @transform_9, window_bounds = array<i64: 16, 16>}, {pipeline_mode = #tpu.pipeline_mode<synchronous>, transform_indices = @transform_10, window_bounds = array<i64: 4, 8, 16>}, {transform_indices = @transform_11, window_bounds = array<i64: 1, 16, 128>}, {transform_indices = @transform_12, window_bounds = array<i64: 1, 8, 64>}]} {
    %c0 = arith.constant 0 : index
    %c0_0 = arith.constant 0 : index
    %c0_1 = arith.constant 0 : index
    %0 = vector.load %arg1[%c0, %c0_0, %c0_1] : memref<1x16x64xf32, #tpu.memory_space<vmem>>, vector<1x16x64xf32>
    %1 = vector.shape_cast %0 : vector<1x16x64xf32> to vector<16x64xf32>
    %c0_2 = arith.constant 0 : index
    %c0_3 = arith.constant 0 : index
    %2 = vector.load %arg9[%c0_2, %c0_3] : memref<16x16xf32, #tpu.memory_space<vmem>>, vector<16x16xf32>
    %c0_4 = arith.constant 0 : index
    %c0_5 = arith.constant 0 : index
    %3 = vector.load %arg10[%c0_4, %c0_5] : memref<16x16xf32, #tpu.memory_space<vmem>>, vector<16x16xf32>
    %cst = arith.constant dense<0.000000e+00> : vector<16x64xf32>
    %4 = tpu.matmul %2, %1, %cst {dimension_numbers = #tpu.dot_dimension_numbers<[1], [0], [0], [1], [0, 0, 1, 1], [], []>} : vector<16x16xf32>, vector<16x64xf32>, vector<16x64xf32> -> vector<16x64xf32>
    %cst_6 = arith.constant dense<0.000000e+00> : vector<16x64xf32>
    %5 = tpu.matmul %3, %1, %cst_6 {dimension_numbers = #tpu.dot_dimension_numbers<[1], [0], [0], [1], [0, 0, 1, 1], [], []>} : vector<16x16xf32>, vector<16x64xf32>, vector<16x64xf32> -> vector<16x64xf32>
    %c0_7 = arith.constant 0 : index
    %c0_8 = arith.constant 0 : index
    %c0_9 = arith.constant 0 : index
    %6 = vector.load %arg2[%c0_7, %c0_8, %c0_9] : memref<3x64x128xf32, #tpu.memory_space<vmem>>, vector<1x64x128xf32>
    %7 = vector.shape_cast %6 : vector<1x64x128xf32> to vector<64x128xf32>
    %cst_10 = arith.constant dense<0.000000e+00> : vector<16x128xf32>
    %8 = tpu.matmul %4, %7, %cst_10 {dimension_numbers = #tpu.dot_dimension_numbers<[1], [0], [0], [1], [0, 0, 1, 1], [], []>} : vector<16x64xf32>, vector<64x128xf32>, vector<16x128xf32> -> vector<16x128xf32>
    %c1 = arith.constant 1 : index
    %c0_11 = arith.constant 0 : index
    %c0_12 = arith.constant 0 : index
    %9 = vector.load %arg2[%c1, %c0_11, %c0_12] : memref<3x64x128xf32, #tpu.memory_space<vmem>>, vector<1x64x128xf32>
    %10 = vector.shape_cast %9 : vector<1x64x128xf32> to vector<64x128xf32>
    %cst_13 = arith.constant dense<0.000000e+00> : vector<16x128xf32>
    %11 = tpu.matmul %1, %10, %cst_13 {dimension_numbers = #tpu.dot_dimension_numbers<[1], [0], [0], [1], [0, 0, 1, 1], [], []>} : vector<16x64xf32>, vector<64x128xf32>, vector<16x128xf32> -> vector<16x128xf32>
    %12 = arith.addf %8, %11 : vector<16x128xf32>
    %c2 = arith.constant 2 : index
    %c0_14 = arith.constant 0 : index
    %c0_15 = arith.constant 0 : index
    %13 = vector.load %arg2[%c2, %c0_14, %c0_15] : memref<3x64x128xf32, #tpu.memory_space<vmem>>, vector<1x64x128xf32>
    %14 = vector.shape_cast %13 : vector<1x64x128xf32> to vector<64x128xf32>
    %cst_16 = arith.constant dense<0.000000e+00> : vector<16x128xf32>
    %15 = tpu.matmul %5, %14, %cst_16 {dimension_numbers = #tpu.dot_dimension_numbers<[1], [0], [0], [1], [0, 0, 1, 1], [], []>} : vector<16x64xf32>, vector<64x128xf32>, vector<16x128xf32> -> vector<16x128xf32>
    %16 = arith.addf %12, %15 : vector<16x128xf32>
    %c0_17 = arith.constant 0 : index
    %c0_18 = arith.constant 0 : index
    %17 = vector.load %arg6[%c0_17, %c0_18] : memref<1x128xf32, #tpu.memory_space<vmem>>, vector<1x128xf32>
    %18 = vector.broadcast %17 : vector<1x128xf32> to vector<16x128xf32>
    %19 = arith.addf %16, %18 : vector<16x128xf32>
    %cst_19 = arith.constant 0.000000e+00 : f32
    %20 = vector.broadcast %cst_19 : f32 to vector<16x128xf32>
    %21 = arith.cmpf oge, %19, %20 : vector<16x128xf32>
    %cst_20 = arith.constant 2.000000e-01 : f32
    %22 = vector.broadcast %cst_20 : f32 to vector<16x128xf32>
    %23 = arith.mulf %22, %19 : vector<16x128xf32>
    %24 = arith.select %21, %19, %23 : vector<16x128xi1>, vector<16x128xf32>
    %c0_21 = arith.constant 0 : index
    %c0_22 = arith.constant 0 : index
    %25 = vector.load %arg3[%c0_21, %c0_22] : memref<64x128xf32, #tpu.memory_space<vmem>>, vector<64x128xf32>
    %cst_23 = arith.constant dense<0.000000e+00> : vector<16x128xf32>
    %26 = tpu.matmul %1, %25, %cst_23 {dimension_numbers = #tpu.dot_dimension_numbers<[1], [0], [0], [1], [0, 0, 1, 1], [], []>} : vector<16x64xf32>, vector<64x128xf32>, vector<16x128xf32> -> vector<16x128xf32>
    %c0_24 = arith.constant 0 : index
    %c0_25 = arith.constant 0 : index
    %27 = vector.load %arg8[%c0_24, %c0_25] : memref<1x128xf32, #tpu.memory_space<vmem>>, vector<1x128xf32>
    %28 = vector.broadcast %27 : vector<1x128xf32> to vector<16x128xf32>
    %29 = arith.addf %26, %28 : vector<16x128xf32>
    %cst_26 = arith.constant dense<0.000000e+00> : vector<16x128xf32>
    %30 = tpu.matmul %2, %24, %cst_26 {dimension_numbers = #tpu.dot_dimension_numbers<[1], [0], [0], [1], [0, 0, 1, 1], [], []>} : vector<16x16xf32>, vector<16x128xf32>, vector<16x128xf32> -> vector<16x128xf32>
    %cst_27 = arith.constant dense<0.000000e+00> : vector<16x128xf32>
    %31 = tpu.matmul %3, %24, %cst_27 {dimension_numbers = #tpu.dot_dimension_numbers<[1], [0], [0], [1], [0, 0, 1, 1], [], []>} : vector<16x16xf32>, vector<16x128xf32>, vector<16x128xf32> -> vector<16x128xf32>
    %c0_28 = arith.constant 0 : index
    %c0_29 = arith.constant 0 : index
    %c0_30 = arith.constant 0 : index
    %32 = vector.load %arg4[%c0_28, %c0_29, %c0_30] : memref<3x128x128xf32, #tpu.memory_space<vmem>>, vector<1x128x128xf32>
    %33 = vector.shape_cast %32 : vector<1x128x128xf32> to vector<128x128xf32>
    %cst_31 = arith.constant dense<0.000000e+00> : vector<16x128xf32>
    %34 = tpu.matmul %30, %33, %cst_31 {dimension_numbers = #tpu.dot_dimension_numbers<[1], [0], [0], [1], [0, 0, 1, 1], [], []>} : vector<16x128xf32>, vector<128x128xf32>, vector<16x128xf32> -> vector<16x128xf32>
    %c1_32 = arith.constant 1 : index
    %c0_33 = arith.constant 0 : index
    %c0_34 = arith.constant 0 : index
    %35 = vector.load %arg4[%c1_32, %c0_33, %c0_34] : memref<3x128x128xf32, #tpu.memory_space<vmem>>, vector<1x128x128xf32>
    %36 = vector.shape_cast %35 : vector<1x128x128xf32> to vector<128x128xf32>
    %cst_35 = arith.constant dense<0.000000e+00> : vector<16x128xf32>
    %37 = tpu.matmul %24, %36, %cst_35 {dimension_numbers = #tpu.dot_dimension_numbers<[1], [0], [0], [1], [0, 0, 1, 1], [], []>} : vector<16x128xf32>, vector<128x128xf32>, vector<16x128xf32> -> vector<16x128xf32>
    %38 = arith.addf %34, %37 : vector<16x128xf32>
    %c2_36 = arith.constant 2 : index
    %c0_37 = arith.constant 0 : index
    %c0_38 = arith.constant 0 : index
    %39 = vector.load %arg4[%c2_36, %c0_37, %c0_38] : memref<3x128x128xf32, #tpu.memory_space<vmem>>, vector<1x128x128xf32>
    %40 = vector.shape_cast %39 : vector<1x128x128xf32> to vector<128x128xf32>
    %cst_39 = arith.constant dense<0.000000e+00> : vector<16x128xf32>
    %41 = tpu.matmul %31, %40, %cst_39 {dimension_numbers = #tpu.dot_dimension_numbers<[1], [0], [0], [1], [0, 0, 1, 1], [], []>} : vector<16x128xf32>, vector<128x128xf32>, vector<16x128xf32> -> vector<16x128xf32>
    %42 = arith.addf %38, %41 : vector<16x128xf32>
    %c0_40 = arith.constant 0 : index
    %c0_41 = arith.constant 0 : index
    %43 = vector.load %arg7[%c0_40, %c0_41] : memref<1x128xf32, #tpu.memory_space<vmem>>, vector<1x128xf32>
    %44 = vector.broadcast %43 : vector<1x128xf32> to vector<16x128xf32>
    %45 = arith.addf %42, %44 : vector<16x128xf32>
    %cst_42 = arith.constant 0.000000e+00 : f32
    %46 = vector.broadcast %cst_42 : f32 to vector<16x128xf32>
    %47 = arith.cmpf oge, %45, %46 : vector<16x128xf32>
    %cst_43 = arith.constant 2.000000e-01 : f32
    %48 = vector.broadcast %cst_43 : f32 to vector<16x128xf32>
    %49 = arith.mulf %48, %45 : vector<16x128xf32>
    %50 = arith.select %47, %45, %49 : vector<16x128xi1>, vector<16x128xf32>
    %51 = arith.addf %50, %29 : vector<16x128xf32>
    %c0_44 = arith.constant 0 : index
    %c0_45 = arith.constant 0 : index
    %c0_46 = arith.constant 0 : index
    %52 = vector.load %arg12[%c0_44, %c0_45, %c0_46] : memref<1x16x128xf32, #tpu.memory_space<vmem>>, vector<1x16x128xf32>
    %53 = vector.shape_cast %52 : vector<1x16x128xf32> to vector<16x128xf32>
    %54 = vector.shape_cast %51 : vector<16x128xf32> to vector<1x16x128xf32>
    tpu.vector_store %arg12[%c0_44, %c0_45, %c0_46], %54 {strides = array<i32>} : memref<1x16x128xf32, #tpu.memory_space<vmem>>, vector<1x16x128xf32>,
    %c0_47 = arith.constant 0 : index
    %c0_48 = arith.constant 0 : index
    %c0_49 = arith.constant 0 : index
    %55 = vector.load %arg11[%c0_47, %c0_48, %c0_49] : memref<4x8x16xf32, #tpu.memory_space<vmem>>, vector<1x8x16xf32>
    %56 = vector.shape_cast %55 : vector<1x8x16xf32> to vector<8x16xf32>
    %cst_50 = arith.constant dense<0.000000e+00> : vector<8x128xf32>
    %57 = tpu.matmul %56, %51, %cst_50 {dimension_numbers = #tpu.dot_dimension_numbers<[1], [0], [0], [1], [0, 0, 1, 1], [], []>} : vector<8x16xf32>, vector<16x128xf32>, vector<8x128xf32> -> vector<8x128xf32>
    %c0_51 = arith.constant 0 : index
    %c0_52 = arith.constant 0 : index
    %c0_53 = arith.constant 0 : index
    %58 = vector.load %arg5[%c0_51, %c0_52, %c0_53] : memref<4x128x64xf32, #tpu.memory_space<vmem>>, vector<1x128x64xf32>
    %59 = vector.shape_cast %58 : vector<1x128x64xf32> to vector<128x64xf32>
    %cst_54 = arith.constant dense<0.000000e+00> : vector<8x64xf32>
    %60 = tpu.matmul %57, %59, %cst_54 {dimension_numbers = #tpu.dot_dimension_numbers<[1], [0], [0], [1], [0, 0, 1, 1], [], []>} : vector<8x128xf32>, vector<128x64xf32>, vector<8x64xf32> -> vector<8x64xf32>
    %c1_55 = arith.constant 1 : index
    %c0_56 = arith.constant 0 : index
    %c0_57 = arith.constant 0 : index
    %61 = vector.load %arg11[%c1_55, %c0_56, %c0_57] : memref<4x8x16xf32, #tpu.memory_space<vmem>>, vector<1x8x16xf32>
    %62 = vector.shape_cast %61 : vector<1x8x16xf32> to vector<8x16xf32>
    %cst_58 = arith.constant dense<0.000000e+00> : vector<8x128xf32>
    %63 = tpu.matmul %62, %51, %cst_58 {dimension_numbers = #tpu.dot_dimension_numbers<[1], [0], [0], [1], [0, 0, 1, 1], [], []>} : vector<8x16xf32>, vector<16x128xf32>, vector<8x128xf32> -> vector<8x128xf32>
    %c1_59 = arith.constant 1 : index
    %c0_60 = arith.constant 0 : index
    %c0_61 = arith.constant 0 : index
    %64 = vector.load %arg5[%c1_59, %c0_60, %c0_61] : memref<4x128x64xf32, #tpu.memory_space<vmem>>, vector<1x128x64xf32>
    %65 = vector.shape_cast %64 : vector<1x128x64xf32> to vector<128x64xf32>
    %cst_62 = arith.constant dense<0.000000e+00> : vector<8x64xf32>
    %66 = tpu.matmul %63, %65, %cst_62 {dimension_numbers = #tpu.dot_dimension_numbers<[1], [0], [0], [1], [0, 0, 1, 1], [], []>} : vector<8x128xf32>, vector<128x64xf32>, vector<8x64xf32> -> vector<8x64xf32>
    %67 = arith.addf %60, %66 : vector<8x64xf32>
    %c2_63 = arith.constant 2 : index
    %c0_64 = arith.constant 0 : index
    %c0_65 = arith.constant 0 : index
    %68 = vector.load %arg11[%c2_63, %c0_64, %c0_65] : memref<4x8x16xf32, #tpu.memory_space<vmem>>, vector<1x8x16xf32>
    %69 = vector.shape_cast %68 : vector<1x8x16xf32> to vector<8x16xf32>
    %cst_66 = arith.constant dense<0.000000e+00> : vector<8x128xf32>
    %70 = tpu.matmul %69, %51, %cst_66 {dimension_numbers = #tpu.dot_dimension_numbers<[1], [0], [0], [1], [0, 0, 1, 1], [], []>} : vector<8x16xf32>, vector<16x128xf32>, vector<8x128xf32> -> vector<8x128xf32>
    %c2_67 = arith.constant 2 : index
    %c0_68 = arith.constant 0 : index
    %c0_69 = arith.constant 0 : index
    %71 = vector.load %arg5[%c2_67, %c0_68, %c0_69] : memref<4x128x64xf32, #tpu.memory_space<vmem>>, vector<1x128x64xf32>
    %72 = vector.shape_cast %71 : vector<1x128x64xf32> to vector<128x64xf32>
    %cst_70 = arith.constant dense<0.000000e+00> : vector<8x64xf32>
    %73 = tpu.matmul %70, %72, %cst_70 {dimension_numbers = #tpu.dot_dimension_numbers<[1], [0], [0], [1], [0, 0, 1, 1], [], []>} : vector<8x128xf32>, vector<128x64xf32>, vector<8x64xf32> -> vector<8x64xf32>
    %74 = arith.addf %67, %73 : vector<8x64xf32>
    %c3 = arith.constant 3 : index
    %c0_71 = arith.constant 0 : index
    %c0_72 = arith.constant 0 : index
    %75 = vector.load %arg11[%c3, %c0_71, %c0_72] : memref<4x8x16xf32, #tpu.memory_space<vmem>>, vector<1x8x16xf32>
    %76 = vector.shape_cast %75 : vector<1x8x16xf32> to vector<8x16xf32>
    %cst_73 = arith.constant dense<0.000000e+00> : vector<8x128xf32>
    %77 = tpu.matmul %76, %51, %cst_73 {dimension_numbers = #tpu.dot_dimension_numbers<[1], [0], [0], [1], [0, 0, 1, 1], [], []>} : vector<8x16xf32>, vector<16x128xf32>, vector<8x128xf32> -> vector<8x128xf32>
    %c3_74 = arith.constant 3 : index
    %c0_75 = arith.constant 0 : index
    %c0_76 = arith.constant 0 : index
    %78 = vector.load %arg5[%c3_74, %c0_75, %c0_76] : memref<4x128x64xf32, #tpu.memory_space<vmem>>, vector<1x128x64xf32>
    %79 = vector.shape_cast %78 : vector<1x128x64xf32> to vector<128x64xf32>
    %cst_77 = arith.constant dense<0.000000e+00> : vector<8x64xf32>
    %80 = tpu.matmul %77, %79, %cst_77 {dimension_numbers = #tpu.dot_dimension_numbers<[1], [0], [0], [1], [0, 0, 1, 1], [], []>} : vector<8x128xf32>, vector<128x64xf32>, vector<8x64xf32> -> vector<8x64xf32>
    %81 = arith.addf %74, %80 : vector<8x64xf32>
    %c0_78 = arith.constant 0 : index
    %c0_79 = arith.constant 0 : index
    %c0_80 = arith.constant 0 : index
    %82 = vector.load %arg13[%c0_78, %c0_79, %c0_80] : memref<1x8x64xf32, #tpu.memory_space<vmem>>, vector<1x8x64xf32>
    %83 = vector.shape_cast %82 : vector<1x8x64xf32> to vector<8x64xf32>
    %84 = vector.shape_cast %81 : vector<8x64xf32> to vector<1x8x64xf32>
    tpu.vector_store %arg13[%c0_78, %c0_79, %c0_80], %84 {strides = array<i32>} : memref<1x8x64xf32, #tpu.memory_space<vmem>>, vector<1x8x64xf32>,
    return
  }
  func.func @transform_0(%arg0: i32) -> (i32, i32, i32) {
    %c0_i32 = arith.constant 0 : i32
    %c0_i32_0 = arith.constant 0 : i32
    %c0_i32_1 = arith.constant 0 : i32
    return %arg0, %c0_i32, %c0_i32_0 : i32, i32, i32
  }
  func.func @transform_1(%arg0: i32) -> (i32, i32, i32) {
    %c0_i32 = arith.constant 0 : i32
    %c0_i32_0 = arith.constant 0 : i32
    %c0_i32_1 = arith.constant 0 : i32
    %c0_i32_2 = arith.constant 0 : i32
    return %c0_i32, %c0_i32_0, %c0_i32_1 : i32, i32, i32
  }
  func.func @transform_2(%arg0: i32) -> (i32, i32) {
    %c0_i32 = arith.constant 0 : i32
    %c0_i32_0 = arith.constant 0 : i32
    %c0_i32_1 = arith.constant 0 : i32
    return %c0_i32, %c0_i32_0 : i32, i32
  }
  func.func @transform_3(%arg0: i32) -> (i32, i32, i32) {
    %c0_i32 = arith.constant 0 : i32
    %c0_i32_0 = arith.constant 0 : i32
    %c0_i32_1 = arith.constant 0 : i32
    %c0_i32_2 = arith.constant 0 : i32
    return %c0_i32, %c0_i32_0, %c0_i32_1 : i32, i32, i32
  }
  func.func @transform_4(%arg0: i32) -> (i32, i32, i32) {
    %c0_i32 = arith.constant 0 : i32
    %c0_i32_0 = arith.constant 0 : i32
    %c0_i32_1 = arith.constant 0 : i32
    %c0_i32_2 = arith.constant 0 : i32
    return %c0_i32, %c0_i32_0, %c0_i32_1 : i32, i32, i32
  }
  func.func @transform_5(%arg0: i32) -> (i32, i32) {
    %c0_i32 = arith.constant 0 : i32
    %c0_i32_0 = arith.constant 0 : i32
    %c0_i32_1 = arith.constant 0 : i32
    return %c0_i32, %c0_i32_0 : i32, i32
  }
  func.func @transform_6(%arg0: i32) -> (i32, i32) {
    %c0_i32 = arith.constant 0 : i32
    %c0_i32_0 = arith.constant 0 : i32
    %c0_i32_1 = arith.constant 0 : i32
    return %c0_i32, %c0_i32_0 : i32, i32
  }
  func.func @transform_7(%arg0: i32) -> (i32, i32) {
    %c0_i32 = arith.constant 0 : i32
    %c0_i32_0 = arith.constant 0 : i32
    %c0_i32_1 = arith.constant 0 : i32
    return %c0_i32, %c0_i32_0 : i32, i32
  }
  func.func @transform_8(%arg0: i32) -> (i32, i32) {
    %c0_i32 = arith.constant 0 : i32
    %c0_i32_0 = arith.constant 0 : i32
    %c0_i32_1 = arith.constant 0 : i32
    return %c0_i32, %c0_i32_0 : i32, i32
  }
  func.func @transform_9(%arg0: i32) -> (i32, i32) {
    %c0_i32 = arith.constant 0 : i32
    %c0_i32_0 = arith.constant 0 : i32
    %c0_i32_1 = arith.constant 0 : i32
    return %c0_i32, %c0_i32_0 : i32, i32
  }
  func.func @transform_10(%arg0: i32) -> (i32, i32, i32) {
    %c0_i32 = arith.constant 0 : i32
    %c0_i32_0 = arith.constant 0 : i32
    %c0_i32_1 = arith.constant 0 : i32
    %c0_i32_2 = arith.constant 0 : i32
    return %c0_i32, %c0_i32_0, %c0_i32_1 : i32, i32, i32
  }
  func.func @transform_11(%arg0: i32) -> (i32, i32, i32) {
    %c0_i32 = arith.constant 0 : i32
    %c0_i32_0 = arith.constant 0 : i32
    %c0_i32_1 = arith.constant 0 : i32
    return %arg0, %c0_i32, %c0_i32_0 : i32, i32, i32
  }
  func.func @transform_12(%arg0: i32) -> (i32, i32, i32) {
    %c0_i32 = arith.constant 0 : i32
    %c0_i32_0 = arith.constant 0 : i32
    %c0_i32_1 = arith.constant 0 : i32
    return %arg0, %c0_i32, %c0_i32_0 : i32, i32, i32
  }
}

</mosaic_0001>

<bundles_post_ra>
// kernel: tile.18
= control target key start
LH: loop header
LB: loop body
LE: loop exit
PB: predicated region body
PF: predicated region fallthrough
CT: control target
= control target key end

     0   :  { %s28_s0 = inlined_call_operand.vmem [shape: f32[8], index: 0, kind: input, shape index: {}]   ;;  %s29_s1 = inlined_call_operand.vmem [shape: f32[16,8], index: 1, kind: output, shape index: {}]  }
   0x1   :  { %v4_v0 = vld [vmem:[%s28_s0] ss:$0 sm:$0xff] }
   0x2   :  { %5 = vst [vmem:[%s29_s1] sm:$0xff] %v4_v0  ;;  %8 = vst [vmem:[%s29_s1 + $0x8] sm:$0xff] %v4_v0 }

// kernel: tile.19
= control target key start
LH: loop header
LB: loop body
LE: loop exit
PB: predicated region body
PF: predicated region fallthrough
CT: control target
= control target key end

     0   :  { %s131_s10 = smov 120   ;;  %s132_s11 = smov 104   ;;  %vm3_vm0 = vcmask 64512   ;;  %vm9_vm1 = vcmask 1048512   ;;  %vm15_vm2 = vcmask 982912   ;;  %vm21_vm3 = vcmask 917312   ;;  %s207_s0 = inlined_call_operand.vmem [shape: f32[16,8], index: 0, kind: input, shape index: {}]   ;;  %s208_s1 = inlined_call_operand.vmem [shape: f32[1,128], index: 1, kind: output, shape index: {}]  }
   0x1   :  { %v101_v0 = vld [vmem:[%s207_s0 + $0xf] sm:$0x1]   ;;  %v103_v1 = vld [vmem:[%s207_s0 + $0xd] sm:$0x1]   ;;  %v102_v2 = vld [vmem:[%s207_s0 + $0xe] sm:$0x1]  }
   0x2   :  { %7 = vrot.lane.b32.xlu0 %v101_v0, %s131_s10  ;;  %19 = vrot.lane.b32.xlu1 %v103_v1, %s132_s11  ;;  %v104_v3 = vld [vmem:[%s207_s0 + $0xc] sm:$0x1]   ;;  %s133_s16 = smov 112   ;;  %s134_s17 = smov 96   ;;  %v105_v4 = vld [vmem:[%s207_s0 + $0xb] sm:$0x1]  }
   0x3   :  { %v106_v5 = vld [vmem:[%s207_s0 + $0xa] sm:$0x1]   ;;  %v2_v6 = vld [vmem:[%s207_s0] sm:$0x1]   ;;  %s135_s24 = smov 88   ;;  %s136_s25 = smov 80  }
   0x4   :  { %4 = vst.msk [vmem:[#allocation0] sm:$0x1] %vm3_vm0, %v2_v6   ;;  %v107_v7 = vld [vmem:[%s207_s0 + $0x9] sm:$0x1]   ;;  %v108_v8 = vld [vmem:[%s207_s0 + $0x8] sm:$0x1]  }
   0x5   :  { %s137_s30 = smov 72   ;;  %s138_s2 = smov 64   ;;  %v109_v9 = vld [vmem:[%s207_s0 + $0x7] sm:$0x1]   ;;  %v110_v10 = vld [vmem:[%s207_s0 + $0x6] sm:$0x1]  }
   0x6   :  { %13 = vrot.lane.b32.xlu0 %v102_v2, %s133_s16  ;;  %25 = vrot.lane.b32.xlu1 %v104_v3, %s134_s17  ;;  %s139_s7 = smov 56   ;;  %s140_s8 = smov 48   ;;  %v111_v11 = vld [vmem:[%s207_s0 + $0x5] sm:$0x1]   ;;  %v112_v12 = vld [vmem:[%s207_s0 + $0x4] sm:$0x1]  }
   0x7   :  { %s141_s13 = smov 40   ;;  %s142_s14 = smov 32   ;;  %v113_v13 = vld [vmem:[%s207_s0 + $0x3] sm:$0x1]   ;;  %v114_v14 = vld [vmem:[%s207_s0 + $0x2] sm:$0x1]  }
   0x8   :  { %s143_s19 = smov 24   ;;  %s144_s20 = smov 16   ;;  %v115_v15 = vld [vmem:[%s207_s0 + $0x1] sm:$0x1]   ;;  %vm27_vm4 = vcmask 851712   ;;  %vm33_vm5 = vcmask 786112  }
   0x9   :  { %s145_s0 = smov 8   ;;  %vm39_vm6 = vcmask 720512   ;;  %vm45_vm7 = vcmask 654912   ;;  %vm51_vm8 = vcmask 589312   ;;  %vm57_vm9 = vcmask 523712  }
   0xa   :  { %31 = vrot.lane.b32.xlu0 %v105_v4, %s135_s24  ;;  %37 = vrot.lane.b32.xlu1 %v106_v5, %s136_s25  ;;  %vm63_vm10 = vcmask 458112   ;;  %vm69_vm11 = vcmask 392512   ;;  %vm75_vm12 = vcmask 326912   ;;  %vm81_vm13 = vcmask 261312  }
   0xb   :  { %vm87_vm14 = vcmask 195712   ;;  %vm93_vm15 = vcmask 130112  }
   0xe   :  { %43 = vrot.lane.b32.xlu0 %v107_v7, %s137_s30  ;;  %49 = vrot.lane.b32.xlu1 %v108_v8, %s138_s2 }
  0x12   :  { %55 = vrot.lane.b32.xlu0 %v109_v9, %s139_s7  ;;  %61 = vrot.lane.b32.xlu1 %v110_v10, %s140_s8 }
  0x16   :  { %67 = vrot.lane.b32.xlu0 %v111_v11, %s141_s13  ;;  %73 = vrot.lane.b32.xlu1 %v112_v12, %s142_s14 }
  0x1a   :  { %79 = vrot.lane.b32.xlu0 %v113_v13, %s143_s19  ;;  %85 = vrot.lane.b32.xlu1 %v114_v14, %s144_s20 }
  0x1e   :  { %91 = vrot.lane.b32.xlu0 %v115_v15, %s145_s0 }
  0x74   :  { %v8_v16 = vpop.permute.xlu0 %7   ;;  %v20_v17 = vpop.permute.xlu1 %19  }
  0x75   :  { %10 = vst.msk [vmem:[#allocation0] sm:$0x1] %vm9_vm1, %v8_v16  }
  0x78   :  { %v14_v18 = vpop.permute.xlu0 %13   ;;  %v26_v19 = vpop.permute.xlu1 %25  }
  0x79   :  { %16 = vst.msk [vmem:[#allocation0] sm:$0x1] %vm15_vm2, %v14_v18  }
  0x7a   :  { %22 = vst.msk [vmem:[#allocation0] sm:$0x1] %vm21_vm3, %v20_v17  }
  0x7b   :  { %28 = vst.msk [vmem:[#allocation0] sm:$0x1] %vm27_vm4, %v26_v19  }
  0x7c   :  { %v32_v20 = vpop.permute.xlu0 %31   ;;  %v38_v21 = vpop.permute.xlu1 %37  }
  0x7d   :  { %34 = vst.msk [vmem:[#allocation0] sm:$0x1] %vm33_vm5, %v32_v20  }
  0x7e   :  { %40 = vst.msk [vmem:[#allocation0] sm:$0x1] %vm39_vm6, %v38_v21  }
  0x80   :  { %v44_v22 = vpop.permute.xlu0 %43   ;;  %v50_v23 = vpop.permute.xlu1 %49  }
  0x81   :  { %46 = vst.msk [vmem:[#allocation0] sm:$0x1] %vm45_vm7, %v44_v22  }
  0x82   :  { %52 = vst.msk [vmem:[#allocation0] sm:$0x1] %vm51_vm8, %v50_v23  }
  0x84   :  { %v56_v24 = vpop.permute.xlu0 %55   ;;  %v62_v25 = vpop.permute.xlu1 %61  }
  0x85   :  { %58 = vst.msk [vmem:[#allocation0] sm:$0x1] %vm57_vm9, %v56_v24  }
  0x86   :  { %64 = vst.msk [vmem:[#allocation0] sm:$0x1] %vm63_vm10, %v62_v25  }
  0x88   :  { %v68_v26 = vpop.permute.xlu0 %67   ;;  %v74_v27 = vpop.permute.xlu1 %73  }
  0x89   :  { %70 = vst.msk [vmem:[#allocation0] sm:$0x1] %vm69_vm11, %v68_v26  }
  0x8a   :  { %76 = vst.msk [vmem:[#allocation0] sm:$0x1] %vm75_vm12, %v74_v27  }
  0x8c   :  { %v80_v28 = vpop.permute.xlu0 %79   ;;  %v86_v29 = vpop.permute.xlu1 %85  }
  0x8d   :  { %82 = vst.msk [vmem:[#allocation0] sm:$0x1] %vm81_vm13, %v80_v28  }
  0x8e   :  { %88 = vst.msk [vmem:[#allocation0] sm:$0x1] %vm87_vm14, %v86_v29  }
  0x90   :  { %v92_v30 = vpop.permute.xlu0 %91  }
  0x91   :  { %94 = vst.msk [vmem:[#allocation0] sm:$0x1] %vm93_vm15, %v92_v30  }
  0x98   :  { %v98_v31 = vld [vmem:[#allocation0] sm:$0x1] }
  0x99   :  { %100 = vst [vmem:[%s208_s1] sm:$0x1] %v98_v31 }

// kernel: unet_conv_block_forward.1
= control target key start
LH: loop header
LB: loop body
LE: loop exit
PB: predicated region body
PF: predicated region fallthrough
CT: control target
= control target key end

     0   :  { %s3239_s21 = smov 0   ;;  %s3838_s0 = inlined_call_operand.vmem [shape: f32[2,16,64], index: 0, kind: input, shape index: {}]   ;;  %s3839_s1 = inlined_call_operand.vmem [shape: f32[3,64,128], index: 1, kind: input, shape index: {}]   ;;  %s3840_s2 = inlined_call_operand.vmem [shape: f32[64,128], index: 2, kind: input, shape index: {}]   ;;  %s3841_s3 = inlined_call_operand.vmem [shape: f32[3,128,128], index: 3, kind: input, shape index: {}]   ;;  %s3842_s4 = inlined_call_operand.vmem [shape: f32[4,128,64], index: 4, kind: input, shape index: {}]   ;;  %s3843_s5 = inlined_call_operand.vmem [shape: f32[1,128], index: 5, kind: input, shape index: {}]   ;;  %s3844_s6 = inlined_call_operand.vmem [shape: f32[1,128], index: 6, kind: input, shape index: {}]   ;;  %s3845_s7 = inlined_call_operand.vmem [shape: f32[1,128], index: 7, kind: input, shape index: {}]   ;;  %s3846_s8 = inlined_call_operand.vmem [shape: f32[16,16], index: 8, kind: input, shape index: {}]   ;;  %s3847_s9 = inlined_call_operand.vmem [shape: f32[16,16], index: 9, kind: input, shape index: {}]   ;;  %s3848_s10 = inlined_call_operand.vmem [shape: f32[4,8,16], index: 10, kind: input, shape index: {}]   ;;  %s3849_s11 = inlined_call_operand.vmem [shape: f32[2,16,128], index: 11, kind: output, shape index: {0}]   ;;  %s3850_s12 = inlined_call_operand.vmem [shape: f32[2,8,64], index: 12, kind: output, shape index: {1}]  }
   0x1 LB: > { %s2152_s22 = sadd.s32 4294967295, %s3169_s21   ;;  %p2156_p0 = scmp.ge.s32.totalorder %s3169_s21, 1  ;;  %s3169_s21 = sphi %s3239_s21, %s23_s21  }
   0x2   : > { %p365_p1 = scmp.lt.s32.totalorder %s3169_s21, 3 }
   0x4   : > { %p366_p2 = pnand %p2156_p0, %p365_p1 }
   0x5   : > { %p411_p3 = scmp.lt.s32.totalorder (!%p366_p2), %s2152_s22, 1  ;;  %v3250_v0 = vld [vmem:[%s3846_s8] sm:$0xff] (!%p366_p2)  ;;  %vm431_vm0 = vcmask (!%p366_p2), 130048   ;;  %v2167_v3 = vld [vmem:[%s3839_s1 + $0x48] sm:$0xff] (!%p366_p2)  ;;  %v2168_v8 = vld [vmem:[%s3839_s1 + $0x50] sm:$0xff] (!%p366_p2)  ;;  %vm611_vm1 = vcmask (!%p366_p2), 523264  }
   0x6   : > { %369 = sbr.rel (%p366_p2) target bundleno = 1623 (0x657), region = 64  ;;  %v3255_v1 = vld [vmem:[%s3847_s9] sm:$0xff] (!%p366_p2)  ;;  %2482 = vmatprep.mubr.msk.f32.mxu0 (!%p366_p2), %vm431_vm0, %v3250_v0  ;;  %v2169_v9 = vld [vmem:[%s3839_s1 + $0x58] sm:$0xff] (!%p366_p2)  ;;  %v3287_v10 = vld [vmem:[%s3846_s8 + $0x8] sm:$0xff] (!%p366_p2)  ;;  %vm3172_vm4 = vmmov (!%p366_p2), 0  }
   0x7   : > { %2489 = vmatprep.mubr.msk.f32.mxu1 (!%p366_p2), %vm431_vm0, %v3255_v1  ;;  %v2166_v2 = vld [vmem:[%s3839_s1 + $0x40] sm:$0xff] (!%p366_p2)  ;;  %v3292_v11 = vld [vmem:[%s3847_s9 + $0x8] sm:$0xff] (!%p366_p2)  ;;  %v2867_v12 = vpack.c.bf16 (!%p366_p2), %v2169_v9, %v2168_v8  ;;  %v2172_v16 = vld [vmem:[%s3839_s1 + $0x70] sm:$0xff] (!%p366_p2) }
   0x8   : > { %v2863_v7 = vpack.c.bf16 (!%p366_p2), %v2167_v3, %v2166_v2  ;;  %v2170_v13 = vld [vmem:[%s3839_s1 + $0x60] sm:$0xff] (!%p366_p2)  ;;  %v2171_v14 = vld [vmem:[%s3839_s1 + $0x68] sm:$0xff] (!%p366_p2)  ;;  %v2173_v17 = vld [vmem:[%s3839_s1 + $0x78] sm:$0xff] (!%p366_p2) }
   0x9   : > { %v2871_v15 = vpack.c.bf16 (!%p366_p2), %v2171_v14, %v2170_v13  ;;  %v2875_v18 = vpack.c.bf16 (!%p366_p2), %v2173_v17, %v2172_v16  ;;  %v594_v19 = vld [vmem:[%s3839_s1] sm:$0xff] (!%p366_p2)  ;;  %v595_v20 = vld [vmem:[%s3839_s1 + $0x8] sm:$0xff] (!%p366_p2)  ;;  %v596_v22 = vld [vmem:[%s3839_s1 + $0x10] sm:$0xff] (!%p366_p2) }
   0xa   : > { %v2879_v21 = vpack.c.bf16 (!%p366_p2), %v595_v20, %v594_v19  ;;  %v597_v23 = vld [vmem:[%s3839_s1 + $0x18] sm:$0xff] (!%p366_p2)  ;;  %v598_v25 = vld [vmem:[%s3839_s1 + $0x20] sm:$0xff] (!%p366_p2)  ;;  %v599_v26 = vld [vmem:[%s3839_s1 + $0x28] sm:$0xff] (!%p366_p2) }
   0xb   : > { %v2883_v24 = vpack.c.bf16 (!%p366_p2), %v597_v23, %v596_v22  ;;  %v2887_v27 = vpack.c.bf16 (!%p366_p2), %v599_v26, %v598_v25  ;;  %v600_v28 = vld [vmem:[%s3839_s1 + $0x30] sm:$0xff] (!%p366_p2)  ;;  %v601_v29 = vld [vmem:[%s3839_s1 + $0x38] sm:$0xff] (!%p366_p2)  ;;  %v2178_v31 = vld [vmem:[%s3839_s1 + $0x80] sm:$0xff] (!%p366_p2) }
   0xc   : > { %v2891_v30 = vpack.c.bf16 (!%p366_p2), %v601_v29, %v600_v28  ;;  %v2179_v32 = vld [vmem:[%s3839_s1 + $0x88] sm:$0xff] (!%p366_p2)  ;;  %v881_v34 = vld [vmem:[%s3840_s2] sm:$0xff] (!%p366_p2)  ;;  %v883_v36 = vld [vmem:[%s3840_s2 + $0x10] sm:$0xff] (!%p366_p2) }
   0xd   : > { %s3852_s22 = smov (!%p411_p3, %s2152_s22), 1  ;;  %v2895_v33 = vpack.c.bf16 %v2179_v32, %v2178_v31  ;;  %v882_v35 = vld [vmem:[%s3840_s2 + $0x8] sm:$0xff]  ;;  %v884_v38 = vld [vmem:[%s3840_s2 + $0x18] sm:$0xff]  ;;  %v2180_v40 = vld [vmem:[%s3839_s1 + $0x90] sm:$0xff] }
   0xe   : > { %s2286_s27 = sshll.u32 %s3852_s22, 4  ;;  %v2911_v37 = vpack.c.bf16 %v882_v35, %v881_v34  ;;  %v2915_v39 = vpack.c.bf16 %v884_v38, %v883_v36  ;;  %v2181_v41 = vld [vmem:[%s3839_s1 + $0x98] sm:$0xff]  ;;  %v2182_v47 = vld [vmem:[%s3839_s1 + $0xa0] sm:$0xff]  ;;  %v2183_v48 = vld [vmem:[%s3839_s1 + $0xa8] sm:$0xff]  ;;  %s2161_s15 = sshll.u32 %s3852_s22, 3 }
   0xf   : > { %s415_s16 = scalar_lea.vmem %s3838_s0, %s2286_s27  ;;  %v2899_v45 = vpack.c.bf16 %v2181_v41, %v2180_v40  ;;  %v2903_v49 = vpack.c.bf16 %v2183_v48, %v2182_v47  ;;  %v2184_v50 = vld [vmem:[%s3839_s1 + $0xb0] sm:$0xff]  ;;  %v2185_v51 = vld [vmem:[%s3839_s1 + $0xb8] sm:$0xff]  ;;  %v885_v53 = vld [vmem:[%s3840_s2 + $0x20] sm:$0xff]  ;;  %s420_s18 = scalar_lea.vmem %s3849_s11, %s2286_s27 }
  0x10   : > { %v425_v4 = vld [vmem:[%s415_s16] sm:$0xff]  ;;  %v3275_v5 = vld [vmem:[%s415_s16 + $0x8] sm:$0xff]  ;;  %v2907_v52 = vpack.c.bf16 %v2185_v51, %v2184_v50  ;;  %v887_v56 = vld [vmem:[%s3840_s2 + $0x30] sm:$0xff] }
  0x11   : > { %v2855_v6 = vpack.c.bf16 %v3275_v5, %v425_v4  ;;  %v886_v54 = vld [vmem:[%s3840_s2 + $0x28] sm:$0xff]  ;;  %v888_v57 = vld [vmem:[%s3840_s2 + $0x38] sm:$0xff]  ;;  %v2188_v59 = vld [vmem:[%s3843_s5] ss:$0 sm:$0xff] }
  0x12   : > { %v2919_v55 = vpack.c.bf16 %v886_v54, %v885_v53  ;;  %v2923_v58 = vpack.c.bf16 %v888_v57, %v887_v56  ;;  %v2198_v9 = vld [vmem:[%s3841_s3 + $0x90] sm:$0xff]  ;;  %v2200_v14 = vld [vmem:[%s3841_s3 + $0xa0] sm:$0xff]  ;;  %v2203_v16 = vld [vmem:[%s3841_s3 + $0xb8] sm:$0xff] }
  0x13   : > { %2856 = vmatprep.subr.bf16.mxu0 %v2855_v6  ;;  %2860 = vmatprep.subr.bf16.mxu1 %v2855_v6  ;;  %v2206_v20 = vld [vmem:[%s3841_s3 + $0xd0] sm:$0xff]  ;;  %v2208_v23 = vld [vmem:[%s3841_s3 + $0xe0] sm:$0xff]  ;;  %v1126_v36 = vld [vmem:[%s3841_s3 + $0x28] sm:$0xff] }
  0x14   : > { %2858 = vmatpush3.bf16.msra.mxu0 %v2855_v6  ;;  %2862 = vmatpush3.bf16.msra.mxu1 %v2855_v6  ;;  %v2210_v26 = vld [vmem:[%s3841_s3 + $0xf0] sm:$0xff]  ;;  %v1121_v29 = vld [vmem:[%s3841_s3] sm:$0xff]  ;;  %v1134_v48 = vld [vmem:[%s3841_s3 + $0x68] sm:$0xff] }
  0x15   : > { %2864 = vmatprep.subr.bf16.mxu0 %v2863_v7  ;;  %2912 = vmatprep.subr.bf16.mxu1 %v2911_v37  ;;  %v1123_v32 = vld [vmem:[%s3841_s3 + $0x10] sm:$0xff]  ;;  %v1125_v35 = vld [vmem:[%s3841_s3 + $0x20] sm:$0xff]  ;;  %v1136_v51 = vld [vmem:[%s3841_s3 + $0x78] sm:$0xff] }
  0x16   : > { %v1127_v38 = vld [vmem:[%s3841_s3 + $0x30] sm:$0xff]  ;;  %v1129_v41 = vld [vmem:[%s3841_s3 + $0x40] sm:$0xff]  ;;  %v2213_v56 = vld [vmem:[%s3841_s3 + $0x108] sm:$0xff] }
  0x17   : > { %2483 = vmatmul.mubr.msk.f32.vlgmr.msra.gmra.mrb[0].mxu0 %vm431_vm0, %v3287_v10  ;;  %2490 = vmatmul.mubr.msk.f32.vlgmr.msra.gmra.mrb[0].mxu1 %vm431_vm0, %v3292_v11  ;;  %v1133_v47 = vld [vmem:[%s3841_s3 + $0x60] sm:$0xff]  ;;  %v1135_v50 = vld [vmem:[%s3841_s3 + $0x70] sm:$0xff] }
  0x18   : > { %2866 = vmatpush3.bf16.msra.mxu0 %v2863_v7  ;;  %2508 = vmatprep.mubr.msk.f32.mxu0 %vm611_vm1, %v425_v4 }
  0x19   : > { %2868 = vmatprep.subr.bf16.mxu0 %v2867_v12  ;;  %2565 = vmatprep.mubr.msk.f32.mxu1 %vm611_vm1, %v425_v4 }
  0x1a   : > { %2914 = vmatpush3.bf16.msra.mxu1 %v2911_v37  ;;  %v2975_v37 = vpack.c.bf16 %v1126_v36, %v1125_v35  ;;  %v2242_v36 = vld [vmem:[%s3842_s4 + $0xd0] sm:$0xff] }
  0x1b   : > { %2916 = vmatprep.subr.bf16.mxu1 %v2915_v39 }
  0x1c   : > { %2870 = vmatpush3.bf16.msra.mxu0 %v2867_v12  ;;  %v2199_v12 = vld [vmem:[%s3841_s3 + $0x98] sm:$0xff] }
  0x1d   : > { %2872 = vmatprep.subr.bf16.mxu0 %v2871_v15  ;;  %v2939_v13 = vpack.c.bf16 %v2199_v12, %v2198_v9  ;;  %v2221_v9 = vld [vmem:[%s3841_s3 + $0x148] sm:$0xff] }
  0x1e   : > { %2918 = vmatpush3.bf16.msra.mxu1 %v2915_v39  ;;  %v1128_v39 = vld [vmem:[%s3841_s3 + $0x38] sm:$0xff] }
  0x1f   : > { %2920 = vmatprep.subr.bf16.mxu1 %v2919_v55  ;;  %v2979_v40 = vpack.c.bf16 %v1128_v39, %v1127_v38  ;;  %v2244_v39 = vld [vmem:[%s3842_s4 + $0xe0] sm:$0xff] }
  0x20   : > { %2874 = vmatpush3.bf16.msra.mxu0 %v2871_v15  ;;  %v2201_v15 = vld [vmem:[%s3841_s3 + $0xa8] sm:$0xff] }
  0x21   : > { %2876 = vmatprep.subr.bf16.mxu0 %v2875_v18 }
  0x22   : > { %2922 = vmatpush3.bf16.msra.mxu1 %v2919_v55  ;;  %v2212_v55 = vld [vmem:[%s3841_s3 + $0x100] sm:$0xff] }
  0x23   : > { %2924 = vmatprep.subr.bf16.mxu1 %v2923_v58  ;;  %v2999_v57 = vpack.c.bf16 %v2213_v56, %v2212_v55 }
  0x24   : > { %2878 = vmatpush3.bf16.msra.mxu0 %v2875_v18  ;;  %v2204_v18 = vld [vmem:[%s3841_s3 + $0xc0] sm:$0xff] }
  0x25   : > { %2880 = vmatprep.subr.bf16.mxu0 %v2879_v21 }
  0x26   : > { %2926 = vmatpush3.bf16.msra.mxu1 %v2923_v58  ;;  %v2214_v58 = vld [vmem:[%s3841_s3 + $0x110] sm:$0xff] }
  0x27   : > { %2509 = vmatmul.mubr.msk.f32.vlgmr.msra.gmra.mrb[2].mxu0 %vm611_vm1, %v3275_v5 }
  0x28   : > { %2882 = vmatpush3.bf16.msra.mxu0 %v2879_v21  ;;  %v2207_v21 = vld [vmem:[%s3841_s3 + $0xd8] sm:$0xff] }
  0x29   : > { %2884 = vmatprep.subr.bf16.mxu0 %v2883_v24  ;;  %2566 = vmatmul.mubr.msk.f32.vlgmr.msra.gmra.mrb[2].mxu1 %vm611_vm1, %v3275_v5  ;;  %v2196_v5 = vld [vmem:[%s3841_s3 + $0x80] sm:$0xff]  ;;  %v2955_v22 = vpack.c.bf16 %v2207_v21, %v2206_v20  ;;  %v3173_v20 = vmov 0.0  }
  0x2a   : > { %2572 = vmatprep.mubr.msk.f32.mxu1 %vm431_vm0, %v3250_v0  ;;  %v2197_v0 = vld [vmem:[%s3841_s3 + $0x88] sm:$0xff]  ;;  %v2232_v21 = vld [vmem:[%s3842_s4 + $0x80] sm:$0xff] }
  0x2b   : > { %v2935_v8 = vpack.c.bf16 %v2197_v0, %v2196_v5  ;;  %v2219_v5 = vld [vmem:[%s3841_s3 + $0x138] sm:$0xff] }
  0x2c   : > { %2886 = vmatpush3.bf16.msra.mxu0 %v2883_v24  ;;  %v2209_v24 = vld [vmem:[%s3841_s3 + $0xe8] sm:$0xff] }
  0x2d   : > { %2888 = vmatprep.subr.bf16.mxu0 %v2887_v27  ;;  %v2959_v25 = vpack.c.bf16 %v2209_v24, %v2208_v23  ;;  %v2234_v24 = vld [vmem:[%s3842_s4 + $0x90] sm:$0xff] }
  0x30   : > { %2890 = vmatpush3.bf16.msra.mxu0 %v2887_v27  ;;  %v2211_v27 = vld [vmem:[%s3841_s3 + $0xf8] sm:$0xff] }
  0x31   : > { %2892 = vmatprep.subr.bf16.mxu0 %v2891_v30  ;;  %v2963_v28 = vpack.c.bf16 %v2211_v27, %v2210_v26  ;;  %v2236_v27 = vld [vmem:[%s3842_s4 + $0xa0] sm:$0xff] }
  0x34   : > { %2894 = vmatpush3.bf16.msra.mxu0 %v2891_v30  ;;  %v1122_v30 = vld [vmem:[%s3841_s3 + $0x8] sm:$0xff] }
  0x35   : > { %2896 = vmatprep.subr.bf16.mxu0 %v2895_v33  ;;  %v2967_v31 = vpack.c.bf16 %v1122_v30, %v1121_v29  ;;  %v2238_v30 = vld [vmem:[%s3842_s4 + $0xb0] sm:$0xff] }
  0xea   : > { %v2484_v42 = vpop.f32.mrb[0].mxu0  ;;  %v2491_v43 = vpop.f32.mrb[0].mxu1 }
  0xeb   : > { %v504_v44 = vpop.f32.mrb[1].mxu0  ;;  %v585_v46 = vpop.f32.mrb[1].mxu1 }
  0xec   : > { %2527 = vmatprep.mubr.msk.f32.mxu0 %vm611_vm1, %v504_v44  ;;  %v1131_v44 = vld [vmem:[%s3841_s3 + $0x50] sm:$0xff] }
  0xed   : > { %2528 = vmatmul.mubr.msk.f32.vlgmr.msra.gmra.mrb[2].mxu0 %vm611_vm1, %v2484_v42  ;;  %v1130_v42 = vld [vmem:[%s3841_s3 + $0x48] sm:$0xff] }
  0xee   : > { %2898 = vmatpush3.bf16.msra.mxu0 %v2895_v33  ;;  %2546 = vmatprep.mubr.msk.f32.mxu0 %vm611_vm1, %v585_v46  ;;  %v1124_v33 = vld [vmem:[%s3841_s3 + $0x18] sm:$0xff] }
  0xef   : > { %2900 = vmatprep.subr.bf16.mxu0 %v2899_v45  ;;  %v2971_v34 = vpack.c.bf16 %v1124_v33, %v1123_v32  ;;  %v2240_v33 = vld [vmem:[%s3842_s4 + $0xc0] sm:$0xff] }
  0xf2   : > { %2902 = vmatpush3.bf16.msra.mxu0 %v2899_v45  ;;  %v1132_v45 = vld [vmem:[%s3841_s3 + $0x58] sm:$0xff] }
  0xf3   : > { %2904 = vmatprep.subr.bf16.mxu0 %v2903_v49  ;;  %v2987_v46 = vpack.c.bf16 %v1132_v45, %v1131_v44  ;;  %v2189_v44 = vld [vmem:[%s3845_s7] ss:$0 sm:$0xff] }
  0xf6   : > { %2906 = vmatpush3.bf16.msra.mxu0 %v2903_v49  ;;  %v2991_v49 = vpack.c.bf16 %v1134_v48, %v1133_v47 }
  0xf7   : > { %2908 = vmatprep.subr.bf16.mxu0 %v2907_v52 }
  0xfa   : > { %2910 = vmatpush3.bf16.msra.mxu0 %v2907_v52  ;;  %v2995_v52 = vpack.c.bf16 %v1136_v51, %v1135_v50 }
  0xfc   : > { %v3499_v53 = vpop.f32.mrb[2].mxu1 }
  0xfd   : > { %2547 = vmatmul.mubr.msk.f32.vlgmr.msra.gmra.mrb[2].mxu0 %vm611_vm1, %v2491_v43  ;;  %v2983_v43 = vpack.c.bf16 %v1130_v42, %v1129_v41  ;;  %v3501_v54 = vpop.f32.mrb[3].mxu1  ;;  %v2228_v42 = vld [vmem:[%s3844_s6] ss:$0 sm:$0xff] }
  0xfe   : > { %2691 = vmatprep.mubr.msk.f32.mxu0 %vm3172_vm4, %v3173_v20  ;;  %v963_v51 = vadd.f32 %v2189_v44, %v3501_v54  ;;  %v1491_v54 = vld [vmem:[%s3842_s4] sm:$0xff] }
 0x1d0   : > { %v2548_v60 = vpop.f32.mrb[2].mxu0 }
 0x1d1   : > { %v874_v61 = vadd.f32 %v2548_v60, %v2188_v59  ;;  %v855_v62 = vpop.f32.mrb[3].mxu0 }
 0x1d2   : > { %v873_v63 = vadd.f32 %v2188_v59, %v855_v62  ;;  %v2215_v59 = vld [vmem:[%s3841_s3 + $0x118] sm:$0xff] }
 0x1d3   : > { %vm876_vm2 = vcmp.ge.f32.partialorder %v874_v61, 0.0  ;;  %v878_v2 = vmul.f32 0.2, %v874_v61  ;;  %v3003_v62 = vpack.c.bf16 %v2215_v59, %v2214_v58  ;;  %v1492_v59 = vld [vmem:[%s3842_s4 + $0x8] sm:$0xff] }
 0x1d4   : > { %vm875_vm3 = vcmp.ge.f32.partialorder %v873_v63, 0.0  ;;  %v877_v3 = vmul.f32 0.2, %v873_v63 }
 0x1d5   : > { %v880_v4 = vsel %vm876_vm2, %v874_v61, %v878_v2  ;;  %v2217_v2 = vld [vmem:[%s3841_s3 + $0x128] sm:$0xff] }
 0x1d6   : > { %v879_v6 = vsel %vm875_vm3, %v873_v63, %v877_v3  ;;  %v2216_v63 = vld [vmem:[%s3841_s3 + $0x120] sm:$0xff] }
 0x1d7   : > { %v2927_v7 = vpack.c.bf16 %v880_v4, %v879_v6 }
 0x1d9   : > { %2928 = vmatprep.subr.bf16.mxu1 %v2927_v7 }
 0x1da   : > { %2930 = vmatpush3.bf16.msra.mxu1 %v2927_v7 }
 0x1db   : > { %2932 = vmatprep.subr.bf16.mxu1 %v2927_v7 }
 0x1dd   : > { %2573 = vmatmul.mubr.msk.f32.vlgmr.msra.gmra.mrb[4].mxu1 %vm431_vm0, %v3287_v10  ;;  %v2943_v10 = vpack.c.bf16 %v2201_v15, %v2200_v14  ;;  %v2223_v14 = vld [vmem:[%s3841_s3 + $0x158] sm:$0xff] }
 0x1de   : > { %2934 = vmatpush3.bf16.msra.mxu1 %v2927_v7  ;;  %2579 = vmatprep.mubr.msk.f32.mxu1 %vm431_vm0, %v3255_v1  ;;  %v2202_v1 = vld [vmem:[%s3841_s3 + $0xb0] sm:$0xff] }
 0x1df   : > { %2936 = vmatprep.subr.bf16.mxu1 %v2935_v8  ;;  %v2947_v17 = vpack.c.bf16 %v2203_v16, %v2202_v1  ;;  %v2218_v7 = vld [vmem:[%s3841_s3 + $0x130] sm:$0xff]  ;;  %v2225_v1 = vld [vmem:[%s3841_s3 + $0x168] sm:$0xff] }
 0x1e0   : > { %v3011_v0 = vpack.c.bf16 %v2219_v5, %v2218_v7  ;;  %v1497_v7 = vld [vmem:[%s3842_s4 + $0x30] sm:$0xff]  ;;  %v1498_v5 = vld [vmem:[%s3842_s4 + $0x38] sm:$0xff] }
 0x1e1   : > { %2580 = vmatmul.mubr.msk.f32.vlgmr.msra.gmra.mrb[6].mxu1 %vm431_vm0, %v3292_v11  ;;  %v2205_v11 = vld [vmem:[%s3841_s3 + $0xc8] sm:$0xff] }
 0x1e2   : > { %2938 = vmatpush3.bf16.msra.mxu1 %v2935_v8  ;;  %2614 = vmatprep.mubr.f32.mxu1 %v879_v6  ;;  %v2951_v19 = vpack.c.bf16 %v2205_v11, %v2204_v18  ;;  %v2220_v8 = vld [vmem:[%s3841_s3 + $0x140] sm:$0xff]  ;;  %v2227_v18 = vld [vmem:[%s3841_s3 + $0x178] sm:$0xff] }
 0x1e3   : > { %2940 = vmatprep.subr.bf16.mxu1 %v2939_v13  ;;  %v3015_v12 = vpack.c.bf16 %v2221_v9, %v2220_v8  ;;  %v1499_v8 = vld [vmem:[%s3842_s4 + $0x40] sm:$0xff]  ;;  %v1500_v9 = vld [vmem:[%s3842_s4 + $0x48] sm:$0xff] }
 0x1e6   : > { %2942 = vmatpush3.bf16.msra.mxu1 %v2939_v13  ;;  %v2222_v13 = vld [vmem:[%s3841_s3 + $0x150] sm:$0xff] }
 0x1e7   : > { %2944 = vmatprep.subr.bf16.mxu1 %v2943_v10  ;;  %v3019_v15 = vpack.c.bf16 %v2223_v14, %v2222_v13  ;;  %v1501_v13 = vld [vmem:[%s3842_s4 + $0x50] sm:$0xff]  ;;  %v1502_v14 = vld [vmem:[%s3842_s4 + $0x58] sm:$0xff] }
 0x1ea   : > { %2946 = vmatpush3.bf16.msra.mxu1 %v2943_v10  ;;  %v2224_v10 = vld [vmem:[%s3841_s3 + $0x160] sm:$0xff] }
 0x1eb   : > { %2948 = vmatprep.subr.bf16.mxu1 %v2947_v17  ;;  %v3023_v16 = vpack.c.bf16 %v2225_v1, %v2224_v10  ;;  %v1503_v10 = vld [vmem:[%s3842_s4 + $0x60] sm:$0xff]  ;;  %v1504_v1 = vld [vmem:[%s3842_s4 + $0x68] sm:$0xff] }
 0x1ee   : > { %2950 = vmatpush3.bf16.msra.mxu1 %v2947_v17  ;;  %v2226_v17 = vld [vmem:[%s3841_s3 + $0x170] sm:$0xff] }
 0x1ef   : > { %2952 = vmatprep.subr.bf16.mxu1 %v2951_v19  ;;  %v3027_v11 = vpack.c.bf16 %v2227_v18, %v2226_v17  ;;  %v1505_v17 = vld [vmem:[%s3842_s4 + $0x70] sm:$0xff]  ;;  %v1506_v18 = vld [vmem:[%s3842_s4 + $0x78] sm:$0xff] }
 0x1f2   : > { %2954 = vmatpush3.bf16.msra.mxu1 %v2951_v19  ;;  %v3171_v19 = vmov 0.0|0.0  }
 0x1f3   : > { %2956 = vmatprep.subr.bf16.mxu1 %v2955_v22  ;;  %3031 = vmatprep.subr.bf16.mxu0 %v3171_v19 }
 0x1f6   : > { %2958 = vmatpush3.bf16.msra.mxu1 %v2955_v22  ;;  %v2233_v22 = vld [vmem:[%s3842_s4 + $0x88] sm:$0xff] }
 0x1f7   : > { %2960 = vmatprep.subr.bf16.mxu1 %v2959_v25  ;;  %v3038_v23 = vpack.c.bf16 %v2233_v22, %v2232_v21  ;;  %v2246_v21 = vld [vmem:[%s3842_s4 + $0xf0] sm:$0xff]  ;;  %v2247_v22 = vld [vmem:[%s3842_s4 + $0xf8] sm:$0xff] }
 0x1fa   : > { %2962 = vmatpush3.bf16.msra.mxu1 %v2959_v25  ;;  %v2235_v25 = vld [vmem:[%s3842_s4 + $0x98] sm:$0xff] }
 0x1fb   : > { %2964 = vmatprep.subr.bf16.mxu1 %v2963_v28  ;;  %v3041_v26 = vpack.c.bf16 %v2235_v25, %v2234_v24  ;;  %v2250_v25 = vld [vmem:[%s3842_s4 + $0x100] sm:$0xff] }
 0x1fe   : > { %2966 = vmatpush3.bf16.msra.mxu1 %v2963_v28  ;;  %v2237_v28 = vld [vmem:[%s3842_s4 + $0xa8] sm:$0xff] }
 0x1ff   : > { %2968 = vmatprep.subr.bf16.mxu1 %v2967_v31  ;;  %v3044_v29 = vpack.c.bf16 %v2237_v28, %v2236_v27  ;;  %v2248_v28 = vld [vmem:[%s3848_s10 + $0x10] sm:$0xff] }
 0x201   : > { %2615 = vmatmul.mubr.f32.vlgmr.msra.gmra.mrb[8].mxu1 %v880_v4  ;;  %v3007_v4 = vpack.c.bf16 %v2217_v2, %v2216_v63  ;;  %v1494_v63 = vld [vmem:[%s3842_s4 + $0x18] sm:$0xff] }
 0x202   : > { %2970 = vmatpush3.bf16.msra.mxu1 %v2967_v31  ;;  %v2239_v31 = vld [vmem:[%s3842_s4 + $0xb8] sm:$0xff] }
 0x203   : > { %2972 = vmatprep.subr.bf16.mxu1 %v2971_v34  ;;  %v3047_v32 = vpack.c.bf16 %v2239_v31, %v2238_v30  ;;  %v2252_v31 = vld [vmem:[%s3842_s4 + $0x110] sm:$0xff] }
 0x206   : > { %2974 = vmatpush3.bf16.msra.mxu1 %v2971_v34  ;;  %v2241_v34 = vld [vmem:[%s3842_s4 + $0xc8] sm:$0xff] }
 0x207   : > { %2976 = vmatprep.subr.bf16.mxu1 %v2975_v37  ;;  %v3050_v35 = vpack.c.bf16 %v2241_v34, %v2240_v33  ;;  %v2266_v34 = vld [vmem:[%s3848_s10 + $0x18] sm:$0xff] }
 0x20a   : > { %2978 = vmatpush3.bf16.msra.mxu1 %v2975_v37  ;;  %v2243_v37 = vld [vmem:[%s3842_s4 + $0xd8] sm:$0xff] }
 0x20b   : > { %2980 = vmatprep.subr.bf16.mxu1 %v2979_v40  ;;  %v3053_v38 = vpack.c.bf16 %v2243_v37, %v2242_v36  ;;  %v2254_v36 = vld [vmem:[%s3842_s4 + $0x120] sm:$0xff]  ;;  %v2255_v37 = vld [vmem:[%s3842_s4 + $0x128] sm:$0xff] }
 0x20e   : > { %2982 = vmatpush3.bf16.msra.mxu1 %v2979_v40  ;;  %v2245_v40 = vld [vmem:[%s3842_s4 + $0xe8] sm:$0xff] }
 0x20f   : > { %2984 = vmatprep.subr.bf16.mxu1 %v2983_v43  ;;  %v3056_v41 = vpack.c.bf16 %v2245_v40, %v2244_v39  ;;  %v2256_v39 = vld [vmem:[%s3842_s4 + $0x130] sm:$0xff]  ;;  %v2257_v40 = vld [vmem:[%s3842_s4 + $0x138] sm:$0xff] }
 0x212   : > { %2986 = vmatpush3.bf16.msra.mxu1 %v2983_v43 }
 0x213   : > { %2988 = vmatprep.subr.bf16.mxu1 %v2987_v46 }
 0x216   : > { %2990 = vmatpush3.bf16.msra.mxu1 %v2987_v46 }
 0x217   : > { %2992 = vmatprep.subr.bf16.mxu1 %v2991_v49 }
 0x21a   : > { %2994 = vmatpush3.bf16.msra.mxu1 %v2991_v49  ;;  %v968_v49 = vadd.f32 %v3499_v53, %v2189_v44  ;;  %v1417_v53 = vld [vmem:[%s3848_s10] sm:$0xff] }
 0x21b   : > { %2996 = vmatprep.subr.bf16.mxu1 %v2995_v52 }
 0x21e   : > { %2998 = vmatpush3.bf16.msra.mxu1 %v2995_v52 }
 0x21f   : > { %3000 = vmatprep.subr.bf16.mxu1 %v2999_v57 }
 0x2b0   : > { %v2574_v60 = vpop.f32.mrb[4].mxu1 }
 0x2b1   : > { %v1037_v61 = vpop.f32.mrb[5].mxu1 }
 0x2b2   : > { %2649 = vmatprep.mubr.f32.mxu1 %v1037_v61  ;;  %v3062_v61 = vpack.c.bf16 %v1492_v59, %v1491_v54  ;;  %v2271_v54 = vld [vmem:[%s3842_s4 + $0x198] sm:$0xff] }
 0x2b3   : > { %2650 = vmatmul.mubr.f32.vlgmr.msra.gmra.mrb[8].mxu1 %v2574_v60  ;;  %v2230_v60 = vld [vmem:[%s3848_s10 + $0x8] sm:$0xff] }
 0x2b4   : > { %3002 = vmatpush3.bf16.msra.mxu1 %v2999_v57  ;;  %v2581_v3 = vpop.f32.mrb[6].mxu1 }
 0x2b5   : > { %3004 = vmatprep.subr.bf16.mxu1 %v3003_v62  ;;  %v1112_v6 = vpop.f32.mrb[7].mxu1 }
 0x2b6   : > { %2684 = vmatprep.mubr.f32.mxu1 %v1112_v6 }
 0x2b8   : > { %3006 = vmatpush3.bf16.msra.mxu1 %v3003_v62  ;;  %v1493_v62 = vld [vmem:[%s3842_s4 + $0x10] sm:$0xff] }
 0x2b9   : > { %3008 = vmatprep.subr.bf16.mxu1 %v3007_v4  ;;  %v3065_v2 = vpack.c.bf16 %v1494_v63, %v1493_v62 }
 0x2bc   : > { %3010 = vmatpush3.bf16.msra.mxu1 %v3007_v4  ;;  %v1496_v4 = vld [vmem:[%s3842_s4 + $0x28] sm:$0xff] }
 0x2bd   : > { %3012 = vmatprep.subr.bf16.mxu1 %v3011_v0 }
 0x2c0   : > { %3014 = vmatpush3.bf16.msra.mxu1 %v3011_v0  ;;  %v3071_v0 = vpack.c.bf16 %v1498_v5, %v1497_v7  ;;  %v2275_v5 = vld [vmem:[%s3842_s4 + $0x1b8] sm:$0xff] }
 0x2c1   : > { %3016 = vmatprep.subr.bf16.mxu1 %v3015_v12 }
 0x2c4   : > { %3018 = vmatpush3.bf16.msra.mxu1 %v3015_v12  ;;  %v3074_v12 = vpack.c.bf16 %v1500_v9, %v1499_v8  ;;  %v2276_v8 = vld [vmem:[%s3842_s4 + $0x1c0] sm:$0xff]  ;;  %v2277_v9 = vld [vmem:[%s3842_s4 + $0x1c8] sm:$0xff] }
 0x2c5   : > { %3020 = vmatprep.subr.bf16.mxu1 %v3019_v15 }
 0x2c8   : > { %3022 = vmatpush3.bf16.msra.mxu1 %v3019_v15  ;;  %v3077_v15 = vpack.c.bf16 %v1502_v14, %v1501_v13  ;;  %v2278_v13 = vld [vmem:[%s3842_s4 + $0x1d0] sm:$0xff]  ;;  %v2279_v14 = vld [vmem:[%s3842_s4 + $0x1d8] sm:$0xff] }
 0x2c9   : > { %3024 = vmatprep.subr.bf16.mxu1 %v3023_v16 }
 0x2cc   : > { %3026 = vmatpush3.bf16.msra.mxu1 %v3023_v16  ;;  %v3080_v16 = vpack.c.bf16 %v1504_v1, %v1503_v10  ;;  %v2280_v10 = vld [vmem:[%s3842_s4 + $0x1e0] sm:$0xff]  ;;  %v2281_v1 = vld [vmem:[%s3842_s4 + $0x1e8] sm:$0xff] }
 0x2cd   : > { %3028 = vmatprep.subr.bf16.mxu1 %v3027_v11 }
 0x2d0   : > { %3030 = vmatpush3.bf16.msra.mxu1 %v3027_v11  ;;  %v3083_v11 = vpack.c.bf16 %v1506_v18, %v1505_v17  ;;  %v2282_v17 = vld [vmem:[%s3842_s4 + $0x1f0] sm:$0xff]  ;;  %v2283_v18 = vld [vmem:[%s3842_s4 + $0x1f8] sm:$0xff] }
 0x2d1   : > { %3037 = vmatprep.subr.bf16.mxu1 %v3171_v19 }
 0x2d3   : > { %2685 = vmatmul.mubr.f32.vlgmr.msra.gmra.mrb[8].mxu1 %v2581_v3  ;;  %v1495_v3 = vld [vmem:[%s3842_s4 + $0x20] sm:$0xff] }
 0x2d4   : > { %2733 = vmatprep.mubr.msk.f32.mxu1 %vm3172_vm4, %v3173_v20  ;;  %3039 = vmatpush3.bf16.msra.mxu1 %v3038_v23  ;;  %v3068_v6 = vpack.c.bf16 %v1496_v4, %v1495_v3  ;;  %v3059_v23 = vpack.c.bf16 %v2247_v22, %v2246_v21  ;;  %v2273_v3 = vld [vmem:[%s3842_s4 + $0x1a8] sm:$0xff] }
 0x2d5   : > { %3040 = vmatprep.subr.bf16.mxu1 %v3171_v19 }
 0x2d8   : > { %3042 = vmatpush3.bf16.msra.mxu1 %v3041_v26  ;;  %v2251_v26 = vld [vmem:[%s3842_s4 + $0x108] sm:$0xff] }
 0x2d9   : > { %3043 = vmatprep.subr.bf16.mxu1 %v3171_v19 }
 0x2dc   : > { %3045 = vmatpush3.bf16.msra.mxu1 %v3044_v29  ;;  %v3089_v29 = vpack.c.bf16 %v2251_v26, %v2250_v25 }
 0x2dd   : > { %3046 = vmatprep.subr.bf16.mxu1 %v3171_v19 }
 0x2e0   : > { %3048 = vmatpush3.bf16.msra.mxu1 %v3047_v32  ;;  %v2253_v32 = vld [vmem:[%s3842_s4 + $0x118] sm:$0xff] }
 0x2e1   : > { %3049 = vmatprep.subr.bf16.mxu1 %v3171_v19 }
 0x2e4   : > { %3051 = vmatpush3.bf16.msra.mxu1 %v3050_v35  ;;  %v3092_v35 = vpack.c.bf16 %v2253_v32, %v2252_v31 }
 0x2e5   : > { %3052 = vmatprep.subr.bf16.mxu1 %v3171_v19 }
 0x2e8   : > { %3054 = vmatpush3.bf16.msra.mxu1 %v3053_v38  ;;  %v3095_v38 = vpack.c.bf16 %v2255_v37, %v2254_v36 }
 0x2e9   : > { %3055 = vmatprep.subr.bf16.mxu1 %v3171_v19 }
 0x2ec   : > { %3057 = vmatpush3.bf16.msra.mxu1 %v3056_v41  ;;  %v3098_v41 = vpack.c.bf16 %v2257_v40, %v2256_v39 }
 0x2ed   : > { %3058 = vmatprep.subr.bf16.mxu1 %v3171_v19 }
 0x2f0   : > { %3060 = vmatpush3.bf16.msra.mxu1 %v3059_v23 }
 0x2f1   : > { %3112 = vmatprep.subr.bf16.mxu1 %v3171_v19 }
 0x3a6   : > { %v2686_v43 = vpop.f32.mrb[8].mxu1 }
 0x3a7   : > { %v1406_v45 = vadd.f32 %v2686_v43, %v2228_v42  ;;  %v1387_v46 = vpop.f32.mrb[9].mxu1  ;;  %v2259_v43 = vld [vmem:[%s3842_s4 + $0x148] sm:$0xff] }
 0x3a8   : > { %v1405_v47 = vadd.f32 %v2228_v42, %v1387_v46  ;;  %v2258_v42 = vld [vmem:[%s3842_s4 + $0x140] sm:$0xff]  ;;  %v2261_v46 = vld [vmem:[%s3842_s4 + $0x158] sm:$0xff] }
 0x3a9   : > { %vm1408_vm5 = vcmp.ge.f32.partialorder %v1406_v45, 0.0  ;;  %v1410_v48 = vmul.f32 0.2, %v1406_v45  ;;  %v3101_v44 = vpack.c.bf16 %v2259_v43, %v2258_v42 }
 0x3aa   : > { %vm1407_vm6 = vcmp.ge.f32.partialorder %v1405_v47, 0.0  ;;  %v1409_v50 = vmul.f32 0.2, %v1405_v47 }
 0x3ab   : > { %v1412_v52 = vsel %vm1408_vm5, %v1406_v45, %v1410_v48  ;;  %v2260_v45 = vld [vmem:[%s3842_s4 + $0x150] sm:$0xff]  ;;  %v2262_v48 = vld [vmem:[%s3842_s4 + $0x160] sm:$0xff] }
 0x3ac   : > { %v1414_v55 = vadd.f32 %v1412_v52, %v968_v49  ;;  %v1411_v56 = vsel %vm1407_vm6, %v1405_v47, %v1409_v50  ;;  %v3104_v47 = vpack.c.bf16 %v2261_v46, %v2260_v45  ;;  %v2263_v49 = vld [vmem:[%s3842_s4 + $0x168] sm:$0xff]  ;;  %v2265_v52 = vld [vmem:[%s3842_s4 + $0x178] sm:$0xff] }
 0x3ad   : > { %v1413_v57 = vadd.f32 %v1411_v56, %v963_v51  ;;  %v3107_v50 = vpack.c.bf16 %v2263_v49, %v2262_v48  ;;  %v2264_v51 = vld [vmem:[%s3842_s4 + $0x170] sm:$0xff]  ;;  %v2268_v56 = vld [vmem:[%s3842_s4 + $0x180] sm:$0xff] }
 0x3ae   : > { %1416 = vst [vmem:[%s420_s18 + $0x8] sm:$0xff] %v1414_v55 }
 0x3af   : > { %1415 = vst [vmem:[%s420_s18] sm:$0xff] %v1413_v57  ;;  %v3619_v58 = vpack.c.bf16 %v1414_v55, %v1413_v57  ;;  %v3110_v55 = vpack.c.bf16 %v2265_v52, %v2264_v51  ;;  %v2269_v57 = vld [vmem:[%s3842_s4 + $0x188] sm:$0xff]  ;;  %s424_s18 = scalar_lea.vmem %s3850_s12, %s2161_s15 }
 0x3b1   : > { %3033 = vmatpush3.bf16.msra.mxu0 %v3619_v58 }
 0x3b2   : > { %3034 = vmatprep.subr.bf16.mxu0 %v3171_v19 }
 0x3b4   : > { %2692 = vmatmul.mubr.msk.f32.vlgmr.msra.gmra.mrb[4].mxu0 %vm431_vm0, %v1417_v53  ;;  %v2270_v53 = vld [vmem:[%s3842_s4 + $0x190] sm:$0xff] }
 0x3b5   : > { %3036 = vmatpush3.bf16.msra.mxu0 %v3619_v58  ;;  %2698 = vmatprep.mubr.msk.f32.mxu0 %vm3172_vm4, %v3173_v20  ;;  %v3119_v63 = vpack.c.bf16 %v2271_v54, %v2270_v53 }
 0x3b6   : > { %3061 = vmatprep.subr.bf16.mxu0 %v3171_v19 }
 0x3b8   : > { %2699 = vmatmul.mubr.msk.f32.vlgmr.msra.gmra.mrb[6].mxu0 %vm431_vm0, %v2230_v60 }
 0x3b9   : > { %3063 = vmatpush3.bf16.msra.mxu0 %v3062_v61  ;;  %2768 = vmatprep.mubr.msk.f32.mxu0 %vm3172_vm4, %v3173_v20 }
 0x3ba   : > { %3064 = vmatprep.subr.bf16.mxu0 %v3171_v19 }
 0x3bd   : > { %3066 = vmatpush3.bf16.msra.mxu0 %v3065_v2  ;;  %v2272_v2 = vld [vmem:[%s3842_s4 + $0x1a0] sm:$0xff] }
 0x3be   : > { %3067 = vmatprep.subr.bf16.mxu0 %v3171_v19  ;;  %v3122_v7 = vpack.c.bf16 %v2273_v3, %v2272_v2 }
 0x3c1   : > { %3069 = vmatpush3.bf16.msra.mxu0 %v3068_v6 }
 0x3c2   : > { %3070 = vmatprep.subr.bf16.mxu0 %v3171_v19 }
 0x3c5   : > { %3072 = vmatpush3.bf16.msra.mxu0 %v3071_v0 }
 0x3c6   : > { %3073 = vmatprep.subr.bf16.mxu0 %v3171_v19 }
 0x3c9   : > { %3075 = vmatpush3.bf16.msra.mxu0 %v3074_v12  ;;  %v3128_v12 = vpack.c.bf16 %v2277_v9, %v2276_v8 }
 0x3ca   : > { %3076 = vmatprep.subr.bf16.mxu0 %v3171_v19 }
 0x3cd   : > { %3078 = vmatpush3.bf16.msra.mxu0 %v3077_v15  ;;  %v3131_v15 = vpack.c.bf16 %v2279_v14, %v2278_v13 }
 0x3ce   : > { %3079 = vmatprep.subr.bf16.mxu0 %v3171_v19 }
 0x3d1   : > { %3081 = vmatpush3.bf16.msra.mxu0 %v3080_v16  ;;  %v3134_v16 = vpack.c.bf16 %v2281_v1, %v2280_v10 }
 0x3d2   : > { %3082 = vmatprep.subr.bf16.mxu0 %v3171_v19 }
 0x3d5   : > { %3084 = vmatpush3.bf16.msra.mxu0 %v3083_v11  ;;  %v3137_v11 = vpack.c.bf16 %v2283_v18, %v2282_v17 }
 0x3d6   : > { %3085 = vmatprep.subr.bf16.mxu0 %v3171_v19 }
 0x487   : > { %v1487_v24 = vpop.f32.mrb[4].mxu0 }
 0x488   : > { %v2693_v27 = vpop.f32.mrb[5].mxu0  ;;  %2769 = vmatmul.mubr.f32.vlgmr.msra.gmra.mrb[8].mxu0 %v1487_v24 }
 0x489   : > { %3087 = vmatpush3.bf16.msra.mxu0 %v3619_v58  ;;  %2775 = vmatprep.mubr.msk.f32.mxu0 %vm3172_vm4, %v3173_v20 }
 0x48a   : > { %3088 = vmatprep.subr.bf16.mxu0 %v3171_v19 }
 0x48b   : > { %v1578_v30 = vpop.f32.mrb[6].mxu0 }
 0x48c   : > { %2734 = vmatmul.mubr.f32.vlgmr.msra.gmra.mrb[10].mxu1 %v1578_v30  ;;  %2776 = vmatmul.mubr.msk.f32.vlgmr.msra.gmra.mrb[10].mxu0 %vm431_vm0, %v2248_v28  ;;  %v2700_v33 = vpop.f32.mrb[7].mxu0 }
 0x48d   : > { %3114 = vmatpush3.bf16.msra.mxu1 %v3619_v58  ;;  %2817 = vmatprep.mubr.msk.f32.mxu1 %vm3172_vm4, %v3173_v20  ;;  %v3116_v58 = vpack.c.bf16 %v2269_v57, %v2268_v56 }
 0x48e   : > { %3090 = vmatpush3.bf16.msra.mxu0 %v3089_v29  ;;  %2810 = vmatprep.mubr.msk.f32.mxu0 %vm3172_vm4, %v3173_v20 }
 0x48f   : > { %3091 = vmatprep.subr.bf16.mxu0 %v3171_v19 }
 0x490   : > { %2818 = vmatmul.mubr.msk.f32.vlgmr.msra.gmra.mrb[12].mxu1 %vm431_vm0, %v2266_v34 }
 0x492   : > { %3093 = vmatpush3.bf16.msra.mxu0 %v3092_v35 }
 0x493   : > { %3094 = vmatprep.subr.bf16.mxu0 %v3171_v19 }
 0x496   : > { %3096 = vmatpush3.bf16.msra.mxu0 %v3095_v38 }
 0x497   : > { %3097 = vmatprep.subr.bf16.mxu0 %v3171_v19 }
 0x49a   : > { %3099 = vmatpush3.bf16.msra.mxu0 %v3098_v41 }
 0x49b   : > { %3100 = vmatprep.subr.bf16.mxu0 %v3171_v19 }
 0x49e   : > { %3102 = vmatpush3.bf16.msra.mxu0 %v3101_v44 }
 0x49f   : > { %3103 = vmatprep.subr.bf16.mxu0 %v3171_v19 }
 0x4a2   : > { %3105 = vmatpush3.bf16.msra.mxu0 %v3104_v47 }
 0x4a3   : > { %3106 = vmatprep.subr.bf16.mxu0 %v3171_v19 }
 0x4a6   : > { %3108 = vmatpush3.bf16.msra.mxu0 %v3107_v50 }
 0x4a7   : > { %3109 = vmatprep.subr.bf16.mxu0 %v3171_v19 }
 0x4aa   : > { %3111 = vmatpush3.bf16.msra.mxu0 %v3110_v55 }
 0x4ab   : > { %3115 = vmatprep.subr.bf16.mxu0 %v3171_v19 }
 0x55f   : > { %v1810_v59 = vpop.f32.mrb[10].mxu0  ;;  %v1665_v60 = vpop.f32.mrb[10].mxu1 }
 0x560   : > { %v2777_v61 = vpop.f32.mrb[11].mxu0  ;;  %2811 = vmatmul.mubr.f32.vlgmr.msra.gmra.mrb[8].mxu0 %v1810_v59  ;;  %v2735_v62 = vpop.f32.mrb[11].mxu1 }
 0x561   : > { %3117 = vmatpush3.bf16.msra.mxu0 %v3116_v58  ;;  %2852 = vmatprep.mubr.msk.f32.mxu0 %vm3172_vm4, %v3173_v20  ;;  %v2274_v20 = vld [vmem:[%s3842_s4 + $0x1b0] sm:$0xff] }
 0x562   : > { %3118 = vmatprep.subr.bf16.mxu0 %v3171_v19  ;;  %v3125_v0 = vpack.c.bf16 %v2275_v5, %v2274_v20 }
 0x563   : > { %v1973_v4 = vpop.f32.mrb[12].mxu1 }
 0x564   : > { %v2819_v6 = vpop.f32.mrb[13].mxu1 }
 0x565   : > { %3120 = vmatpush3.bf16.msra.mxu0 %v3119_v63 }
 0x566   : > { %3121 = vmatprep.subr.bf16.mxu0 %v3171_v19 }
 0x569   : > { %3123 = vmatpush3.bf16.msra.mxu0 %v3122_v7 }
 0x56a   : > { %3124 = vmatprep.subr.bf16.mxu0 %v3171_v19 }
 0x56d   : > { %3126 = vmatpush3.bf16.msra.mxu0 %v3125_v0 }
 0x56e   : > { %3127 = vmatprep.subr.bf16.mxu0 %v3171_v19 }
 0x571   : > { %3129 = vmatpush3.bf16.msra.mxu0 %v3128_v12 }
 0x572   : > { %3130 = vmatprep.subr.bf16.mxu0 %v3171_v19 }
 0x575   : > { %3132 = vmatpush3.bf16.msra.mxu0 %v3131_v15 }
 0x576   : > { %3133 = vmatprep.subr.bf16.mxu0 %v3171_v19 }
 0x579   : > { %3135 = vmatpush3.bf16.msra.mxu0 %v3134_v16 }
 0x57a   : > { %3136 = vmatprep.subr.bf16.mxu0 %v3171_v19 }
 0x57d   : > { %3138 = vmatpush3.bf16.msra.mxu0 %v3137_v11 }
 0x580   : > { %2853 = vmatmul.mubr.f32.vlgmr.msra.gmra.mrb[8].mxu0 %v1973_v4 }
 0x653   : > { %v2060_v21 = vpop.f32.mrb[8].mxu0 }
 0x654   : > { %v3139_v22 = vadd.f32 %v2060_v21, %v1665_v60  ;;  %v2854_v23 = vpop.f32.mrb[9].mxu0 }
 0x656   : > { %2065 = vst.msk [vmem:[%s424_s18] sm:$0xff] %vm611_vm1, %v3139_v22 }
 0x657 PF: > { %s23_s21 = sadd.s32 1, %s3169_s21  }
 0x658   : > { %p20_p4 = scmp.ge.s32.totalorder %s23_s21, 4  }
 0x65a   :  { %22 = sbr.rel (!%p20_p4) target bundleno = 1 (0x1), region = 116 }

</bundles_post_ra>
